<compile_context>
chip_gen: v6e
topology: v6e:2x2x1
jax: 0.10.0
libtpu: 0.0.40
codegen_flags: <defaults>
</compile_context>

<pallas_src>
import functools

import jax
import jax.numpy as jnp
from jax.experimental import pallas as pl
from jax.experimental.pallas import tpu as pltpu

HID = 300            # PepLand embedding dim (input_dim of the MLP)
HIDDEN_DIMS = [256, 128]

_D_PAD = 384                     # 300 lanes pad to 3 * 128 in VMEM
_VMEM_SLACK = 2 * 1024 * 1024    # headroom for compiler-internal scratch


def _pad8(n):
    return ((n + 7) // 8) * 8


def _tpu_generation():
    """Best-effort (physical VMEM bytes, multi-TensorCore?, device_kind)."""
    vmem = None
    kind = ""
    two_tc = False
    try:
        kind = jax.devices()[0].device_kind.lower()
    except Exception:
        pass
    try:
        info = pltpu.get_tpu_info()
        for attr in ("vmem_capacity_bytes", "vmem_bytes", "vmem_size_bytes"):
            v = getattr(info, attr, None)
            if v:
                vmem = int(v)
                break
    except Exception:
        pass
    try:
        two_tc = int(getattr(jax.devices()[0], "num_cores", 1)) > 1
    except Exception:
        pass
    if "v7" in kind or "7x" in kind.replace(" ", ""):
        two_tc = True
        if vmem is None:
            vmem = 64 * 1024 * 1024          # v7x: 64 MiB per TensorCore
    if vmem is None:
        vmem = 128 * 1024 * 1024             # v5e / v6e physical VMEM
    return vmem, two_tc, kind


def _pick_tb(b, target, want_two_programs):
    """Batch tile: multiple of 8 (or == B); ensure >=2 programs on multi-TC parts."""
    if b <= 8:
        return b
    tb = max((min(target, b) // 8) * 8, 8)
    if want_two_programs and -(-b // tb) < 2:
        half = ((-(-b // 2) + 7) // 8) * 8
        if half < b:
            tb = half
    return tb


def _pick_tla(na, target, budget_bytes, tb, itemsize):
    """Atom-seq tile: largest multiple of 8 <= target that fits the VMEM budget.

    Never falls back to the full dimension unless it actually fits; a non-dividing
    tile is handled with an in-kernel mask on the last grid step.
    """
    per_unit = 2 * tb * _D_PAD * itemsize          # double-buffered bytes / seq element
    if na <= target and na * per_unit <= budget_bytes:
        return na                                  # single streamed step, full Na
    max_by_budget = max(budget_bytes // per_unit, 8)
    tla = min(target, max_by_budget, na)
    tla = max((tla // 8) * 8, 8)
    if tla >= na:
        return na
    return int(tla)


def _property_predictor_kernel(atom_ref, frag_ref, w1_ref, b1_ref, w2_ref,
                               b2_ref, w3_ref, b3_ref, out_ref, acc_ref,
                               *, inv_total, na_total, tla, mask_seq):
    """Fused avg-pool (streamed reduction over the atom sequence) + MLP head.

    Grid: (B tiles ['parallel'], atom-seq tiles ['arbitrary' reduction]).
      atom_ref : (TB, TLA, D)   streamed tile of atom_rep
      frag_ref : (TB, Nf,  D)   frag_rep block, resident across the reduction axis
      w1 (D,H1)  b1 (1,H1)  w2 (H1,H2)  b2 (1,H2)  w3 (1,H2)  b3 (1,1)  [resident]
      out_ref  : (TB, 1)
      acc_ref  : (TB, D) f32 scratch accumulator
    """
    l = pl.program_id(1)

    @pl.when(l == 0)
    def _():
        # Init accumulator with the fragment contribution (fetched once per B tile).
        acc_ref[...] = jnp.sum(frag_ref[...].astype(jnp.float32), axis=1)

    # Streamed atom-sequence contribution.
    x = atom_ref[...].astype(jnp.float32)
    if mask_seq:
        # Last tile may extend past Na: zero the out-of-range sequence rows.
        valid = na_total - l * tla
        idx = jax.lax.broadcasted_iota(jnp.int32, x.shape, 1)
        x = jnp.where(idx < valid, x, 0.0)
    # NOTE: sublane-axis reduce; the kernel is HBM-bound so the XLU work is hidden.
    # If a bundle dump ever shows the XLU slot binding at large TLA, swap for a
    # ones-vector dot_general (MXU) or an unrolled fori_loop of (TB, D) VPU adds.
    acc_ref[...] += jnp.sum(x, axis=1)

    @pl.when(l == pl.num_programs(1) - 1)
    def _():
        pooled = acc_ref[...] * inv_total                         # mean over (Na + Nf)

        # linear_0 -> relu (dropout is identity at inference)
        h = jnp.dot(pooled, w1_ref[...], preferred_element_type=jnp.float32)
        h = jnp.maximum(h + b1_ref[...], 0.0)                     # (TB, H1)

        # linear_1 -> relu
        h = jnp.dot(h, w2_ref[...], preferred_element_type=jnp.float32)
        h = jnp.maximum(h + b2_ref[...], 0.0)                     # (TB, H2)

        # output -> sigmoid : N=1 layer as VPU multiply + lane reduce (no MXU push).
        logit = jnp.sum(h * w3_ref[...], axis=-1, keepdims=True) + b3_ref[...]
        out_ref[...] = jax.nn.sigmoid(logit).astype(out_ref.dtype)


@functools.partial(jax.jit, static_argnames=("tb", "tla"))
def property_predictor_forward(atom_rep, frag_rep, params, *, tb=None, tla=None):
    """params = (w1, b1, w2, b2, w3, b3); w stored as (in, out), biases as (1, out)."""
    w1, b1, w2, b2, w3, b3 = params
    B, Na, D = atom_rep.shape
    _, Nf, _ = frag_rep.shape
    H1 = w1.shape[1]
    H2 = w2.shape[1]

    w3_row = w3.reshape(1, H2)                 # (H2, 1) -> (1, H2) for the VPU reduce

    # ---- generation-aware VMEM budget & tile targets -------------------------------
    vmem_phys, two_tc, kind = _tpu_generation()
    vmem_limit = int(min(96 * 1024 * 1024, (vmem_phys * 3) // 4))   # 96 MiB v5e/v6e, 48 MiB v7x

    if two_tc:                                 # v7x: 64 MiB VMEM/TC, 2 TCs share HBM
        tb_target, tla_target = 128, 128
    elif "v6" in kind:                         # v6e: 2x256^2 MXU, 128 MiB VMEM
        tb_target, tla_target = 256, 256
    else:                                      # v5e / unknown
        tb_target, tla_target = 128, 256
    if tb is not None:
        tb_target = tb
    if tla is not None:
        tla_target = tla

    itemsize = jnp.dtype(atom_rep.dtype).itemsize
    # Resident weights/biases (double-buffered by the pipeline, f32, padded layouts).
    wb_bytes = 2 * 4 * (_pad8(D) * H1 + _pad8(H1) * H2
                        + 8 * H1 + 8 * H2 + 8 * 128 + 8 * 128)

    TB = _pick_tb(B, tb_target, two_tc)
    while True:
        fixed = (2 * TB * _pad8(Nf) * _D_PAD * itemsize            # frag double buffer
                 + wb_bytes
                 + _pad8(TB) * _D_PAD * 4                          # acc scratch
                 + 2 * _pad8(TB) * 128 * 4                         # out double buffer
                 + _VMEM_SLACK)
        budget = vmem_limit - fixed
        if budget >= 2 * TB * 8 * _D_PAD * itemsize or TB <= 8 or TB >= B:
            break
        TB = max(((TB // 2) // 8) * 8, 8)                          # shrink TB if frag/weights dominate

    TLA = _pick_tla(Na, tla_target, budget, TB, itemsize)
    grid = (-(-B // TB), -(-Na // TLA))
    mask_seq = (Na % TLA) != 0

    # TODO(synk): for very long fragment sequences on v7x (64 MiB VMEM), fold frag into
    # the streamed reduction axis instead of keeping it resident per batch tile.

    kernel = functools.partial(_property_predictor_kernel,
                               inv_total=1.0 / float(Na + Nf),
                               na_total=Na, tla=TLA, mask_seq=mask_seq)

    def resident(shape):                       # DMA'd once per batch tile, stays in VMEM
        return pl.BlockSpec(shape, lambda b, l: (0,) * len(shape))

    param_bytes = sum(int(p.size) * jnp.dtype(p.dtype).itemsize for p in params)
    cost = pl.CostEstimate(
        flops=int(B * ((Na + Nf) * D + 2 * (D * H1 + H1 * H2 + H2))),
        transcendentals=int(B),
        bytes_accessed=int(atom_rep.size * itemsize
                           + frag_rep.size * jnp.dtype(frag_rep.dtype).itemsize
                           + grid[0] * param_bytes + B * 4),
    )

    return pl.pallas_call(
        kernel,
        out_shape=jax.ShapeDtypeStruct((B, 1), jnp.float32),
        grid_spec=pltpu.PrefetchScalarGridSpec(
            num_scalar_prefetch=0,
            grid=grid,
            in_specs=[
                pl.BlockSpec((TB, TLA, D), lambda b, l: (b, l, 0)),  # atom stream
                pl.BlockSpec((TB, Nf, D), lambda b, l: (b, 0, 0)),   # frag (resident over l)
                resident((D, H1)), resident((1, H1)),
                resident((H1, H2)), resident((1, H2)),
                resident((1, H2)), resident((1, 1)),
            ],
            out_specs=pl.BlockSpec((TB, 1), lambda b, l: (b, 0)),
            scratch_shapes=[pltpu.VMEM((TB, D), jnp.float32)],
        ),
        compiler_params=pltpu.CompilerParams(
            dimension_semantics=("parallel", "arbitrary"),
            vmem_limit_bytes=vmem_limit,
        ),
        cost_estimate=cost,
    )(atom_rep, frag_rep, w1, b1, w2, b2, w3_row, b3)


def init_params(key):
    """Deterministic synthetic parameters matching the nn.Linear shapes."""
    dims = [HID] + HIDDEN_DIMS + [1]
    params = []
    for i in range(len(dims) - 1):
        key, kw, kb = jax.random.split(key, 3)
        fan_in = dims[i]
        bound = 1.0 / jnp.sqrt(fan_in)
        # stored as (in, out) so the kernel does x @ W (equivalent to torch x @ W.T)
        w = jax.random.uniform(kw, (dims[i], dims[i + 1]), jnp.float32, -bound, bound)
        b = jax.random.uniform(kb, (1, dims[i + 1]), jnp.float32, -bound, bound)
        params += [w, b]
    return tuple(params)


def reference_forward(atom_rep, frag_rep, params):
    """Pure-JAX reference with the PyTorch semantics (concat -> mean -> MLP -> sigmoid)."""
    w1, b1, w2, b2, w3, b3 = params
    x = jnp.concatenate([atom_rep.astype(jnp.float32),
                         frag_rep.astype(jnp.float32)], axis=1)
    pooled = jnp.mean(x, axis=1)
    h = jnp.maximum(pooled @ w1 + b1, 0.0)
    h = jnp.maximum(h @ w2 + b2, 0.0)
    return jax.nn.sigmoid(h @ w3 + b3)


# TODO(synk): the PepLandFeatureExtractor GNN backbone (DGL hetero-graph model + RDKit
# SMILES tokenization) and the optional GRU pooling path are not translatable to Pallas;
# the kernel consumes the atom/fragment embeddings directly.

if __name__ == "__main__":
    key = jax.random.PRNGKey(0)
    k_atom, k_frag, k_params = jax.random.split(key, 3)

    B, NA, NF = 2, 8, 4      # small batch, 8 atom tokens, 4 fragment tokens
    atom_rep = jax.random.normal(k_atom, (B, NA, HID), jnp.bfloat16)
    frag_rep = jax.random.normal(k_frag, (B, NF, HID), jnp.bfloat16)
    params = init_params(k_params)

    out = property_predictor_forward(atom_rep, frag_rep, params)
    out = jax.block_until_ready(out)

    ref = reference_forward(atom_rep, frag_rep, params)
    assert out.shape == (B, 1)
    assert jnp.allclose(out, ref, atol=1e-4, rtol=1e-4), (out, ref)

    print("KERNEL_OK")
</pallas_src>

<mosaic_0001>
module attributes {stable_mosaic.version = 11 : i64} {
  func.func @_property_predictor_kernel(%arg0: i32, %arg1: i32, %arg2: memref<2x8x300xbf16, #tpu.memory_space<vmem>>, %arg3: memref<2x4x300xbf16, #tpu.memory_space<vmem>>, %arg4: memref<300x256xf32, #tpu.memory_space<vmem>>, %arg5: memref<1x256xf32, #tpu.memory_space<vmem>>, %arg6: memref<256x128xf32, #tpu.memory_space<vmem>>, %arg7: memref<1x128xf32, #tpu.memory_space<vmem>>, %arg8: memref<1x128xf32, #tpu.memory_space<vmem>>, %arg9: memref<1x1xf32, #tpu.memory_space<vmem>>, %arg10: memref<2x1xf32, #tpu.memory_space<vmem>>, %arg11: memref<2x300xf32, #tpu.memory_space<vmem>>) attributes {dimension_semantics = [#tpu.dimension_semantics<parallel>, #tpu.dimension_semantics<arbitrary>], iteration_bounds = array<i64: 1, 1>, scalar_prefetch = 0 : i64, scratch_operands = 1 : i64, tpu.core_type = #tpu.core_type<tc>, window_params = [{transform_indices = @transform_0, window_bounds = array<i64: 2, 8, 300>}, {transform_indices = @transform_1, window_bounds = array<i64: 2, 4, 300>}, {pipeline_mode = #tpu.pipeline_mode<synchronous>, transform_indices = @transform_2, window_bounds = array<i64: 300, 256>}, {pipeline_mode = #tpu.pipeline_mode<synchronous>, transform_indices = @transform_3, window_bounds = array<i64: 1, 256>}, {pipeline_mode = #tpu.pipeline_mode<synchronous>, transform_indices = @transform_4, window_bounds = array<i64: 256, 128>}, {pipeline_mode = #tpu.pipeline_mode<synchronous>, transform_indices = @transform_5, window_bounds = array<i64: 1, 128>}, {pipeline_mode = #tpu.pipeline_mode<synchronous>, transform_indices = @transform_6, window_bounds = array<i64: 1, 128>}, {pipeline_mode = #tpu.pipeline_mode<synchronous>, transform_indices = @transform_7, window_bounds = array<i64: 1, 1>}, {transform_indices = @transform_8, window_bounds = array<i64: 2, 1>}]} {
    %c0_i32 = arith.constant 0 : i32
    %0 = arith.cmpi eq, %arg1, %c0_i32 : i32
    %1 = arith.extui %0 : i1 to i32
    %c0_i32_0 = arith.constant 0 : i32
    %2 = arith.cmpi ne, %1, %c0_i32_0 : i32
    scf.if %2 {
      %c0_9 = arith.constant 0 : index
      %c0_10 = arith.constant 0 : index
      %c0_11 = arith.constant 0 : index
      %12 = vector.load %arg3[%c0_9, %c0_10, %c0_11] : memref<2x4x300xbf16, #tpu.memory_space<vmem>>, vector<2x4x300xbf16>
      %13 = arith.extf %12 : vector<2x4x300xbf16> to vector<2x4x300xf32>
      %cst_12 = arith.constant dense<0.000000e+00> : vector<2x300xf32>
      %14 = vector.multi_reduction <add>, %13, %cst_12 [1] : vector<2x4x300xf32> to vector<2x300xf32>
      %c0_13 = arith.constant 0 : index
      %c0_14 = arith.constant 0 : index
      %15 = vector.load %arg11[%c0_13, %c0_14] : memref<2x300xf32, #tpu.memory_space<vmem>>, vector<2x300xf32>
      tpu.vector_store %arg11[%c0_13, %c0_14], %14 {strides = array<i32>} : memref<2x300xf32, #tpu.memory_space<vmem>>, vector<2x300xf32>,
    } else {
    }
    %c0 = arith.constant 0 : index
    %c0_1 = arith.constant 0 : index
    %c0_2 = arith.constant 0 : index
    %3 = vector.load %arg2[%c0, %c0_1, %c0_2] : memref<2x8x300xbf16, #tpu.memory_space<vmem>>, vector<2x8x300xbf16>
    %4 = arith.extf %3 : vector<2x8x300xbf16> to vector<2x8x300xf32>
    %c0_3 = arith.constant 0 : index
    %c0_4 = arith.constant 0 : index
    %5 = vector.load %arg11[%c0_3, %c0_4] : memref<2x300xf32, #tpu.memory_space<vmem>>, vector<2x300xf32>
    %cst = arith.constant dense<0.000000e+00> : vector<2x300xf32>
    %6 = vector.multi_reduction <add>, %4, %cst [1] : vector<2x8x300xf32> to vector<2x300xf32>
    %7 = arith.addf %5, %6 : vector<2x300xf32>
    %c0_5 = arith.constant 0 : index
    %c0_6 = arith.constant 0 : index
    %8 = vector.load %arg11[%c0_5, %c0_6] : memref<2x300xf32, #tpu.memory_space<vmem>>, vector<2x300xf32>
    tpu.vector_store %arg11[%c0_5, %c0_6], %7 {strides = array<i32>} : memref<2x300xf32, #tpu.memory_space<vmem>>, vector<2x300xf32>,
    %c0_i32_7 = arith.constant 0 : i32
    %9 = arith.cmpi eq, %arg1, %c0_i32_7 : i32
    %10 = arith.extui %9 : i1 to i32
    %c0_i32_8 = arith.constant 0 : i32
    %11 = arith.cmpi ne, %10, %c0_i32_8 : i32
    scf.if %11 {
      %c0_9 = arith.constant 0 : index
      %c0_10 = arith.constant 0 : index
      %12 = vector.load %arg11[%c0_9, %c0_10] : memref<2x300xf32, #tpu.memory_space<vmem>>, vector<2x300xf32>
      %cst_11 = arith.constant 0.0833333358 : f32
      %13 = vector.broadcast %cst_11 : f32 to vector<2x300xf32>
      %14 = arith.mulf %12, %13 : vector<2x300xf32>
      %c0_12 = arith.constant 0 : index
      %c0_13 = arith.constant 0 : index
      %15 = vector.load %arg4[%c0_12, %c0_13] : memref<300x256xf32, #tpu.memory_space<vmem>>, vector<300x256xf32>
      %cst_14 = arith.constant dense<0.000000e+00> : vector<2x256xf32>
      %16 = tpu.matmul %14, %15, %cst_14 {dimension_numbers = #tpu.dot_dimension_numbers<[1], [0], [0], [1], [0, 0, 1, 1], [], []>} : vector<2x300xf32>, vector<300x256xf32>, vector<2x256xf32> -> vector<2x256xf32>
      %c0_15 = arith.constant 0 : index
      %c0_16 = arith.constant 0 : index
      %17 = vector.load %arg5[%c0_15, %c0_16] : memref<1x256xf32, #tpu.memory_space<vmem>>, vector<1x256xf32>
      %18 = vector.broadcast %17 : vector<1x256xf32> to vector<2x256xf32>
      %19 = arith.addf %16, %18 : vector<2x256xf32>
      %cst_17 = arith.constant 0.000000e+00 : f32
      %20 = vector.broadcast %cst_17 : f32 to vector<2x256xf32>
      %21 = arith.maximumf %19, %20 : vector<2x256xf32>
      %c0_18 = arith.constant 0 : index
      %c0_19 = arith.constant 0 : index
      %22 = vector.load %arg6[%c0_18, %c0_19] : memref<256x128xf32, #tpu.memory_space<vmem>>, vector<256x128xf32>
      %cst_20 = arith.constant dense<0.000000e+00> : vector<2x128xf32>
      %23 = tpu.matmul %21, %22, %cst_20 {dimension_numbers = #tpu.dot_dimension_numbers<[1], [0], [0], [1], [0, 0, 1, 1], [], []>} : vector<2x256xf32>, vector<256x128xf32>, vector<2x128xf32> -> vector<2x128xf32>
      %c0_21 = arith.constant 0 : index
      %c0_22 = arith.constant 0 : index
      %24 = vector.load %arg7[%c0_21, %c0_22] : memref<1x128xf32, #tpu.memory_space<vmem>>, vector<1x128xf32>
      %25 = vector.broadcast %24 : vector<1x128xf32> to vector<2x128xf32>
      %26 = arith.addf %23, %25 : vector<2x128xf32>
      %cst_23 = arith.constant 0.000000e+00 : f32
      %27 = vector.broadcast %cst_23 : f32 to vector<2x128xf32>
      %28 = arith.maximumf %26, %27 : vector<2x128xf32>
      %c0_24 = arith.constant 0 : index
      %c0_25 = arith.constant 0 : index
      %29 = vector.load %arg8[%c0_24, %c0_25] : memref<1x128xf32, #tpu.memory_space<vmem>>, vector<1x128xf32>
      %30 = vector.broadcast %29 : vector<1x128xf32> to vector<2x128xf32>
      %31 = arith.mulf %28, %30 : vector<2x128xf32>
      %cst_26 = arith.constant dense<0.000000e+00> : vector<2xf32>
      %32 = vector.multi_reduction <add>, %31, %cst_26 [1] : vector<2x128xf32> to vector<2xf32>
      %33 = vector.shape_cast %32 : vector<2xf32> to vector<2x1xf32>
      %c0_27 = arith.constant 0 : index
      %c0_28 = arith.constant 0 : index
      %34 = vector.load %arg9[%c0_27, %c0_28] : memref<1x1xf32, #tpu.memory_space<vmem>>, vector<1x1xf32>
      %35 = vector.broadcast %34 : vector<1x1xf32> to vector<2x1xf32>
      %36 = arith.addf %33, %35 : vector<2x1xf32>
      %37 = arith.negf %36 : vector<2x1xf32>
      %38 = math.exp %37 : vector<2x1xf32>
      %cst_29 = arith.constant 1.000000e+00 : f32
      %39 = vector.broadcast %cst_29 : f32 to vector<2x1xf32>
      %40 = arith.addf %39, %38 : vector<2x1xf32>
      %41 = arith.divf %39, %40 : vector<2x1xf32>
      %c0_30 = arith.constant 0 : index
      %c0_31 = arith.constant 0 : index
      %42 = vector.load %arg10[%c0_30, %c0_31] : memref<2x1xf32, #tpu.memory_space<vmem>>, vector<2x1xf32>
      tpu.vector_store %arg10[%c0_30, %c0_31], %41 {strides = array<i32>} : memref<2x1xf32, #tpu.memory_space<vmem>>, vector<2x1xf32>,
    } else {
    }
    return
  }
  func.func @transform_0(%arg0: i32, %arg1: i32) -> (i32, i32, i32) {
    %c0_i32 = arith.constant 0 : i32
    %c0_i32_0 = arith.constant 0 : i32
    return %arg0, %arg1, %c0_i32 : i32, i32, i32
  }
  func.func @transform_1(%arg0: i32, %arg1: i32) -> (i32, i32, i32) {
    %c0_i32 = arith.constant 0 : i32
    %c0_i32_0 = arith.constant 0 : i32
    %c0_i32_1 = arith.constant 0 : i32
    return %arg0, %c0_i32, %c0_i32_0 : i32, i32, i32
  }
  func.func @transform_2(%arg0: i32, %arg1: i32) -> (i32, i32) {
    %c0_i32 = arith.constant 0 : i32
    %c0_i32_0 = arith.constant 0 : i32
    %c0_i32_1 = arith.constant 0 : i32
    return %c0_i32, %c0_i32_0 : i32, i32
  }
  func.func @transform_3(%arg0: i32, %arg1: i32) -> (i32, i32) {
    %c0_i32 = arith.constant 0 : i32
    %c0_i32_0 = arith.constant 0 : i32
    %c0_i32_1 = arith.constant 0 : i32
    return %c0_i32, %c0_i32_0 : i32, i32
  }
  func.func @transform_4(%arg0: i32, %arg1: i32) -> (i32, i32) {
    %c0_i32 = arith.constant 0 : i32
    %c0_i32_0 = arith.constant 0 : i32
    %c0_i32_1 = arith.constant 0 : i32
    return %c0_i32, %c0_i32_0 : i32, i32
  }
  func.func @transform_5(%arg0: i32, %arg1: i32) -> (i32, i32) {
    %c0_i32 = arith.constant 0 : i32
    %c0_i32_0 = arith.constant 0 : i32
    %c0_i32_1 = arith.constant 0 : i32
    return %c0_i32, %c0_i32_0 : i32, i32
  }
  func.func @transform_6(%arg0: i32, %arg1: i32) -> (i32, i32) {
    %c0_i32 = arith.constant 0 : i32
    %c0_i32_0 = arith.constant 0 : i32
    %c0_i32_1 = arith.constant 0 : i32
    return %c0_i32, %c0_i32_0 : i32, i32
  }
  func.func @transform_7(%arg0: i32, %arg1: i32) -> (i32, i32) {
    %c0_i32 = arith.constant 0 : i32
    %c0_i32_0 = arith.constant 0 : i32
    %c0_i32_1 = arith.constant 0 : i32
    return %c0_i32, %c0_i32_0 : i32, i32
  }
  func.func @transform_8(%arg0: i32, %arg1: i32) -> (i32, i32) {
    %c0_i32 = arith.constant 0 : i32
    %c0_i32_0 = arith.constant 0 : i32
    return %arg0, %c0_i32 : i32, i32
  }
}

</mosaic_0001>

<bundles_post_ra>
// kernel: property_predictor_forward.1
= control target key start
LH: loop header
LB: loop body
LE: loop exit
PB: predicated region body
PF: predicated region fallthrough
CT: control target
= control target key end

     0   :  { %s1038_s0 = inlined_call_operand.hbm [shape: bf16[2,8,300], index: 0, kind: input, shape index: {}]   ;;  %s1039_s1 = inlined_call_operand.hbm [shape: bf16[2,4,300], index: 1, kind: input, shape index: {}]   ;;  %s1040_s2 = inlined_call_operand.hbm [shape: f32[300,256], index: 2, kind: input, shape index: {}]   ;;  %s1041_s3 = inlined_call_operand.vmem [shape: f32[1,256], index: 3, kind: input, shape index: {}]   ;;  %s1042_s4 = inlined_call_operand.hbm [shape: f32[256,128], index: 4, kind: input, shape index: {}]   ;;  %s1043_s5 = inlined_call_operand.vmem [shape: f32[1,128], index: 5, kind: input, shape index: {}]   ;;  %s1044_s6 = inlined_call_operand.vmem [shape: f32[1,128], index: 6, kind: input, shape index: {}]   ;;  %s1045_s7 = inlined_call_operand.<no memory space> [shape: f32[1,1], index: 7, kind: input, shape index: {}]   ;;  %s1046_s8 = inlined_call_operand.vmem [shape: f32[2,1], index: 8, kind: output, shape index: {}]  }
   0x1   :  { %v13_v0 = vstv %s1045_s7 }
   0x2   :  { %14 = vst [vmem:[#allocation3] sm:$0x1] %v13_v0 }
   0x3   :  { %15 = vsyncpa [#allocation5], 0 }
   0x4   :  { %16 = vsyncpa [#allocation7], 0 }
   0x5   :  { %17 = vsyncpa [#allocation10], 0  ;;  %s868_s29 = smov [#allocation6]  }
   0x6   :  { %s35_s30 = sshll.u32 %s868_s29, 4  ;;  %s36_s30 = int_to_ptr.vmem [resolvable:$true] %s35_s30 }
   0x7   :  { %s790_s9 = scalar_lea.vmem %s36_s30, 192  ;;  %p795_p1 = scmp.lt.s32.totalorder %s36_s30, %s36_s30 }
   0x8   :  { %p791_p0 = scmp.ne.s32.totalorder %s36_s30, %s790_s9  ;;  %p796_p2 = scmp.lt.s32.totalorder %s790_s9, %s790_s9 }
   0xa   :  { %p797_p3 = por %p796_p2, %p795_p1 }
   0xc   :  { %p798_p4 = pnand %p797_p3, %p791_p0 }
   0xe   :  { %801 = shalt.err (!%p798_p4)
}
   0xf   :  { %s869_s10 = smov 96   ;;  %s870_s11 = smov 6  }
  0x10   :  { %41 = dma.hbm_to_vmem [thread:$0]  %s1039_s1, 192, %s36_s30, [#allocation7], %s869_s10, %s869_s10, %s870_s11  }
  0x11   :  { %s871_s7 = smov [#allocation4]  }
  0x12   :  { %s23_s14 = sshll.u32 %s871_s7, 4  ;;  %s24_s14 = int_to_ptr.vmem [resolvable:$true] %s23_s14 }
  0x13   :  { %s810_s15 = scalar_lea.vmem %s24_s14, 384  ;;  %p815_p6 = scmp.lt.s32.totalorder %s24_s14, %s24_s14 }
  0x14   :  { %p811_p5 = scmp.ne.s32.totalorder %s24_s14, %s810_s15  ;;  %p816_p7 = scmp.lt.s32.totalorder %s810_s15, %s810_s15 }
  0x16   :  { %p817_p8 = por %p816_p7, %p815_p6 }
  0x18   :  { %p818_p9 = pnand %p817_p8, %p811_p5 }
  0x1a   :  { %821 = shalt.err (!%p818_p9)
}
  0x1b   :  { %s872_s16 = smov 192   ;;  %s873_s17 = smov 12  }
  0x1c   :  { %29 = dma.hbm_to_vmem [thread:$0]  %s1038_s0, 384, %s24_s14, [#allocation5], %s872_s16, %s872_s16, %s873_s17  }
  0x1d   :  { %s874_s20 = smov [#allocation8]  }
  0x1e   :  { %s47_s21 = sshll.u32 %s874_s20, 4  ;;  %s48_s21 = int_to_ptr.vmem [resolvable:$true] %s47_s21 }
  0x1f   :  { %s830_s1 = scalar_lea.vmem %s48_s21, 9728  ;;  %p835_p11 = scmp.lt.s32.totalorder %s48_s21, %s48_s21 }
  0x20   :  { %p831_p10 = scmp.ne.s32.totalorder %s48_s21, %s830_s1  ;;  %p836_p12 = scmp.lt.s32.totalorder %s830_s1, %s830_s1 }
  0x22   :  { %p837_p13 = por %p836_p12, %p835_p11 }
  0x24   :  { %p838_p0 = pnand %p837_p13, %p831_p10 }
  0x26   :  { %841 = shalt.err (!%p838_p0)
}
  0x27   :  { %s875_s22 = smov 256   ;;  %s876_s23 = smov 16  }
  0x28   :  { %53 = dma.hbm_to_vmem [thread:$0]  %s1040_s2, 9728, %s48_s21, [#allocation7], %s875_s22, %s875_s22, %s876_s23  }
  0x29   :  { %s877_s26 = smov [#allocation9]  }
  0x2a   :  { %s61_s27 = sshll.u32 %s877_s26, 4  ;;  %s62_s27 = int_to_ptr.vmem [resolvable:$true] %s61_s27 }
  0x2b   :  { %s850_s0 = scalar_lea.vmem %s62_s27, 4096  ;;  %p855_p2 = scmp.lt.s32.totalorder %s62_s27, %s62_s27 }
  0x2c   :  { %p851_p1 = scmp.ne.s32.totalorder %s62_s27, %s850_s0  ;;  %p856_p3 = scmp.lt.s32.totalorder %s850_s0, %s850_s0 }
  0x2e   :  { %p857_p4 = por %p856_p3, %p855_p2 }
  0x30   :  { %p858_p5 = pnand %p857_p4, %p851_p1 }
  0x32   :  { %861 = shalt.err (!%p858_p5)
}
  0x33   :  { %s878_s28 = smov 128   ;;  %s879_s29 = smov 8  }
  0x34   :  { %67 = dma.hbm_to_vmem [thread:$0]  %s1042_s4, 4096, %s62_s27, [#allocation10], %s878_s28, %s878_s28, %s879_s29  }
  0x35   :  { %862 = dma.done.wait [#allocation5], 384  }
  0x36   :  { %863 = vsyncadd [#allocation5], 4294966912 }
  0x37   :  { %864 = dma.done.wait [#allocation7], 9920  }
  0x38   :  { %865 = vsyncadd [#allocation7], 4294957376 }
  0x39   :  { %866 = dma.done.wait [#allocation10], 4096  }
  0x3a   :  { %867 = vsyncadd [#allocation10], 4294963200  ;;  %v880_v1 = vmov 0.0   ;;  %v349_v2 = vld [vmem:[#allocation8 + $0xf8] sm:$0xff]  ;;  %v348_v3 = vld [vmem:[#allocation8 + $0xf0] sm:$0xff]  ;;  %v156_v18 = vlaneseq  ;;  %vm102_vm0 = vcmask 1043456  }
  0x3b   :  { %569 = vmatprep.mubr.f32.mxu1 %v880_v1  ;;  %v347_v4 = vld [vmem:[#allocation8 + $0xe8] sm:$0xff]  ;;  %434 = vmatprep.subr.mxu0 %v349_v2  ;;  %v346_v5 = vld [vmem:[#allocation8 + $0xe0] sm:$0xff]  ;;  %v345_v6 = vld [vmem:[#allocation8 + $0xd8] sm:$0xff]  ;;  %v881_v16 = vmov 1983009808   ;;  %vm117_vm1 = vcmask 355328  }
  0x3c   :  { %435 = vmatpush1.msra.mxu0 %v348_v3  ;;  %v344_v7 = vld [vmem:[#allocation8 + $0xd0] sm:$0xff]  ;;  %v343_v8 = vld [vmem:[#allocation8 + $0xc8] sm:$0xff]  ;;  %v342_v9 = vld [vmem:[#allocation8 + $0xc0] sm:$0xff]  ;;  %v154_v17 = vunpack.c.l.s4 %v881_v16  ;;  %v942_v24 = vshrl.u32 %v156_v18, 7  ;;  %vm227_vm2 = vcmask 359424   ;;  %vm198_vm3 = vcmask 1041408  }
  0x3d   :  { %436 = vmatprep.subr.mxu0 %v347_v4  ;;  %v341_v10 = vld [vmem:[#allocation8 + $0xb8] sm:$0xff]  ;;  %v340_v11 = vld [vmem:[#allocation8 + $0xb0] sm:$0xff]  ;;  %v339_v12 = vld [vmem:[#allocation8 + $0xa8] sm:$0xff]  ;;  %vm199_vm4 = vcmask 1043458   ;;  %vm189_vm5 = vcmask 1041409   ;;  %vm191_vm6 = vcmask 1043459  }
  0x3e   :  { %437 = vmatpush1.msra.mxu0 %v346_v5  ;;  %v338_v13 = vld [vmem:[#allocation8 + $0xa0] sm:$0xff]  ;;  %v337_v14 = vld [vmem:[#allocation8 + $0x98] sm:$0xff]  ;;  %v336_v15 = vld [vmem:[#allocation8 + $0x90] sm:$0xff]  ;;  %v155_v23 = vunpack.c.0.s8 %v154_v17  ;;  %vm201_vm8 = vcmask 357380   ;;  %vm193_vm9 = vcmask 1045509   ;;  %vm195_vm10 = vcmask 1047559  }
  0x3f   :  { %438 = vmatprep.subr.mxu0 %v345_v6  ;;  %v335_v19 = vld [vmem:[#allocation8 + $0x88] sm:$0xff]  ;;  %v334_v20 = vld [vmem:[#allocation8 + $0x80] sm:$0xff]  ;;  %v333_v21 = vld [vmem:[#allocation8 + $0x78] sm:$0xff]  ;;  %vm713_vm12 = vcmask 1024  }
  0x40   :  { %439 = vmatpush1.msra.mxu0 %v344_v7  ;;  %v332_v22 = vld [vmem:[#allocation8 + $0x70] sm:$0xff]  ;;  %v331_v25 = vld [vmem:[#allocation8 + $0x68] sm:$0xff]  ;;  %v330_v26 = vld [vmem:[#allocation8 + $0x60] sm:$0xff]  ;;  %v947_v36 = vsub.s32 %v155_v23, %v942_v24 }
  0x41   :  { %440 = vmatprep.subr.mxu0 %v343_v8  ;;  %v90_v27 = vld [vmem:[#allocation6] sm:$0x3f]  ;;  %v91_v29 = vld [vmem:[#allocation6 + $0x6] sm:$0x3f]  ;;  %v949_v37 = vld [vmem:[#allocation4 + $0x8] ss:$12 sps:$4 sm:$0xff]  }
  0x42   :  { %441 = vmatpush1.msra.mxu0 %v342_v9  ;;  %v329_v28 = vld [vmem:[#allocation8 + $0x58] sm:$0xff]  ;;  %v92_v30 = vunpack.c.l.bf16 %v90_v27  ;;  %v93_v31 = vunpack.c.h.bf16 %v90_v27  ;;  %v328_v33 = vld [vmem:[#allocation8 + $0x50] sm:$0xff]  ;;  %v94_v34 = vunpack.c.l.bf16 %v91_v29  ;;  %v95_v35 = vunpack.c.h.bf16 %v91_v29  ;;  %v327_v40 = vld [vmem:[#allocation8 + $0x48] sm:$0xff] }
  0x43   :  { %442 = vmatprep.subr.mxu0 %v341_v10  ;;  %v944_v32 = vld [vmem:[#allocation4] sm:$0xff]  ;;  %v393_v39 = vld [vmem:[#allocation8 + $0x258] sm:$0xf]  ;;  %v392_v45 = vld [vmem:[#allocation8 + $0x250] sm:$0xf]  ;;  %v210_v58 = vunpack.c.l.bf16 %v949_v37 }
  0x44   :  { %443 = vmatpush1.msra.mxu0 %v340_v11  ;;  %v208_v38 = vunpack.c.l.bf16 %v944_v32  ;;  %v98_v41 = vcombine.high %v92_v30, %v92_v30  ;;  %v103_v42 = vsel %vm102_vm0, %v92_v30, 0.0  ;;  %v118_v43 = vsel %vm117_vm1, %v93_v31, 0.0  ;;  %722 = vmatprep.subr.msk.mxu1 %vm102_vm0, %v393_v39  ;;  %v391_v46 = vld [vmem:[#allocation8 + $0x248] sm:$0xff]  ;;  %v326_v47 = vld [vmem:[#allocation8 + $0x40] sm:$0xff]  ;;  %v325_v54 = vld [vmem:[#allocation8 + $0x38] sm:$0xff] }
  0x45   :  { %444 = vmatprep.subr.mxu0 %v339_v12  ;;  %v209_v44 = vunpack.c.h.bf16 %v944_v32  ;;  %v99_v48 = vcombine.high %v94_v34, %v94_v34  ;;  %v104_v49 = vrot.slane %v103_v42, 4  ;;  %v119_v50 = vrot.slane %v118_v43, 4  ;;  %v957_v52 = vld [vmem:[#allocation4 + $0xc] sm:$0xff]  ;;  %723 = vmatpush1.msk.msra.mxu1 %vm102_vm0, %v392_v45  ;;  %v390_v53 = vld [vmem:[#allocation8 + $0x240] sm:$0xff]  ;;  %v389_v59 = vld [vmem:[#allocation8 + $0x238] sm:$0xff] }
  0x46   :  { %445 = vmatpush1.msra.mxu0 %v338_v13  ;;  %v125_v51 = vsel %vm102_vm0, %v94_v34, 0.0  ;;  %v110_v55 = vsel %vm102_vm0, %v98_v41, 0.0  ;;  %v139_v57 = vsel %vm117_vm1, %v95_v35, 0.0  ;;  %527 = vmatprep.subr.mxu1 %v391_v46  ;;  %v388_v60 = vld [vmem:[#allocation8 + $0x230] sm:$0xff]  ;;  %v387_v2 = vld [vmem:[#allocation8 + $0x228] sm:$0xff]  ;;  %v211_v7 = vunpack.c.l.bf16 %v957_v52  ;;  %v386_v8 = vld [vmem:[#allocation8 + $0x220] sm:$0xff] }
  0x47   :  { %446 = vmatprep.subr.mxu0 %v337_v14  ;;  %v126_v56 = vrot.slane %v125_v51, 4  ;;  %v324_v61 = vld [vmem:[#allocation8 + $0x30] sm:$0xff]  ;;  %v105_v62 = vadd.f32 %v104_v49, %v103_v42  ;;  %v111_v63 = vrot.slane %v110_v55, 4  ;;  %v120_v0 = vadd.f32 %v119_v50, %v118_v43  ;;  %528 = vmatpush1.msra.mxu1 %v390_v53  ;;  %v323_v3 = vld [vmem:[#allocation8 + $0x28] sm:$0xff]  ;;  %v322_v9 = vld [vmem:[#allocation8 + $0x20] sm:$0xff] }
  0x48   :  { %447 = vmatpush1.msra.mxu0 %v336_v15  ;;  %v132_v1 = vsel %vm102_vm0, %v99_v48, 0.0  ;;  %v140_v6 = vrot.slane %v139_v57, 4  ;;  %529 = vmatprep.subr.mxu1 %v389_v59  ;;  %v212_v13 = vunpack.c.h.bf16 %v957_v52  ;;  %v385_v14 = vld [vmem:[#allocation8 + $0x218] sm:$0xff]  ;;  %v383_v27 = vld [vmem:[#allocation8 + $0x208] sm:$0xff]  ;;  %v382_v34 = vld [vmem:[#allocation8 + $0x200] sm:$0xff] }
  0x49   :  { %448 = vmatprep.subr.mxu0 %v335_v19  ;;  %v127_v4 = vadd.f32 %v126_v56, %v125_v51  ;;  %v133_v5 = vrot.slane %v132_v1, 4  ;;  %v106_v10 = vrot.slane %v105_v62, 2  ;;  %v112_v11 = vadd.f32 %v111_v63, %v110_v55  ;;  %530 = vmatpush1.msra.mxu1 %v388_v60  ;;  %v321_v15 = vld [vmem:[#allocation8 + $0x18] sm:$0xff]  ;;  %v318_v35 = vld [vmem:[#allocation8] sm:$0xff]  ;;  %v379_v55 = vld [vmem:[#allocation8 + $0x1e8] sm:$0xff] }
  0x4a   :  { %449 = vmatpush1.msra.mxu0 %v334_v20  ;;  %v121_v12 = vrot.slane %v120_v0, 2  ;;  %v141_v18 = vadd.f32 %v140_v6, %v139_v57  ;;  %v215_v19 = vrot.slane %v208_v38, 4  ;;  %531 = vmatprep.subr.mxu1 %v387_v2  ;;  %v384_v20 = vld [vmem:[#allocation8 + $0x210] sm:$0xff]  ;;  %v609_v43 = vld [vmem:[#allocation9 + $0xf8] sm:$0xff]  ;;  %v378_v59 = vld [vmem:[#allocation8 + $0x1e0] sm:$0xff]  ;;  %v228_v63 = vsel %vm227_vm2, %v210_v58, 0.0 }
  0x4b   :  { %450 = vmatprep.subr.mxu0 %v333_v21  ;;  %v128_v16 = vrot.slane %v127_v4, 2  ;;  %v134_v17 = vadd.f32 %v133_v5, %v132_v1  ;;  %v320_v21 = vld [vmem:[#allocation8 + $0x10] sm:$0xff]  ;;  %v113_v23 = vrot.slane %v112_v11, 2  ;;  %532 = vmatpush1.msra.mxu1 %v386_v8  ;;  %v381_v45 = vld [vmem:[#allocation8 + $0x1f8] sm:$0xff]  ;;  %vm993_vm7 = vmor %vm199_vm4, %vm198_vm3 }
  0x4c   :  { %451 = vmatpush1.msra.mxu0 %v332_v22  ;;  %v107_v22 = vadd.f32 %v106_v10, %v105_v62  ;;  %v142_v31 = vrot.slane %v141_v18, 2  ;;  %533 = vmatprep.subr.mxu1 %v385_v14  ;;  %v376_v5 = vld [vmem:[#allocation8 + $0x1d0] sm:$0xff]  ;;  %v241_v10 = vrot.slane %v212_v13, 4  ;;  %vm1002_vm11 = vmor %vm201_vm8, %vm993_vm7 }
  0x4d   :  { %452 = vmatprep.subr.mxu0 %v331_v25  ;;  %v122_v25 = vadd.f32 %v121_v12, %v120_v0  ;;  %v129_v29 = vadd.f32 %v128_v16, %v127_v4  ;;  %v135_v30 = vrot.slane %v134_v17, 2  ;;  %534 = vmatpush1.msra.mxu1 %v384_v20  ;;  %v377_v0 = vld [vmem:[#allocation8 + $0x1d8] sm:$0xff]  ;;  %v229_v4 = vrot.slane %v228_v63, 4 }
  0x4e   :  { %453 = vmatpush1.msra.mxu0 %v330_v26  ;;  %v221_v26 = vrot.slane %v209_v44, 4  ;;  %v108_v39 = vrot.slane %v107_v22, 1  ;;  %v143_v48 = vadd.f32 %v142_v31, %v141_v18  ;;  %535 = vmatprep.subr.mxu1 %v383_v27  ;;  %v242_v18 = vadd.f32 %v241_v10, %v212_v13  ;;  %v370_v31 = vld [vmem:[#allocation8 + $0x1a0] sm:$0xff] }
  0x4f   :  { %454 = vmatprep.subr.mxu0 %v329_v28  ;;  %v319_v28 = vld [vmem:[#allocation8 + $0x8] sm:$0xff]  ;;  %v123_v41 = vrot.slane %v122_v25, 1  ;;  %v130_v46 = vrot.slane %v129_v29, 1  ;;  %536 = vmatpush1.msra.mxu1 %v382_v34  ;;  %v230_v14 = vadd.f32 %v229_v4, %v228_v63 }
  0x50   :  { %455 = vmatpush1.msra.mxu0 %v328_v33  ;;  %v216_v33 = vadd.f32 %v215_v19, %v208_v38  ;;  %v222_v42 = vadd.f32 %v221_v26, %v209_v44  ;;  %v380_v38 = vld [vmem:[#allocation8 + $0x1f0] sm:$0xff]  ;;  %v109_v50 = vadd.f32 %v108_v39, %v107_v22  ;;  %v144_v56 = vrot.slane %v143_v48, 1  ;;  %729 = vmatprep.subr.mxu1 %v609_v43  ;;  %v373_v19 = vld [vmem:[#allocation8 + $0x1b8] sm:$0xff]  ;;  %v363_v63 = vld [vmem:[#allocation8 + $0x168] sm:$0xff] }
  0x51   :  { %456 = vmatprep.subr.mxu0 %v327_v40  ;;  %v114_v40 = vadd.f32 %v113_v23, %v112_v11  ;;  %v124_v53 = vadd.f32 %v123_v41, %v122_v25  ;;  %v131_v32 = vadd.f32 %v130_v46, %v129_v29  ;;  %v372_v23 = vld [vmem:[#allocation8 + $0x1b0] sm:$0xff]  ;;  %v243_v27 = vrot.slane %v242_v18, 2  ;;  %v371_v29 = vld [vmem:[#allocation8 + $0x1a8] sm:$0xff]  ;;  %v369_v39 = vld [vmem:[#allocation8 + $0x198] sm:$0xff] }
  0x52   :  { %457 = vmatpush1.msra.mxu0 %v326_v47  ;;  %v136_v47 = vadd.f32 %v135_v30, %v134_v17  ;;  %v217_v49 = vrot.slane %v216_v33, 2  ;;  %v145_v2 = vadd.f32 %v144_v56, %v143_v48  ;;  %v368_v43 = vld [vmem:[#allocation8 + $0x190] sm:$0xff]  ;;  %v367_v48 = vld [vmem:[#allocation8 + $0x188] sm:$0xff]  ;;  %v365_v56 = vld [vmem:[#allocation8 + $0x178] sm:$0xff] }
  0x53   :  { %458 = vmatprep.subr.mxu0 %v325_v54  ;;  %v115_v51 = vrot.slane %v114_v40, 1  ;;  %v223_v54 = vrot.slane %v222_v42, 2  ;;  %v244_v34 = vadd.f32 %v243_v27, %v242_v18  ;;  %v350_v27 = vld [vmem:[#allocation8 + $0x100] sm:$0xff] }
  0x54   :  { %459 = vmatpush1.msra.mxu0 %v324_v61  ;;  %v137_v44 = vrot.slane %v136_v47, 1  ;;  %v218_v57 = vadd.f32 %v217_v49, %v216_v33  ;;  %v213_v61 = vunpack.c.h.bf16 %v949_v37  ;;  %v375_v37 = vld [vmem:[#allocation8 + $0x1c8] sm:$0xff]  ;;  %v182_v11 = vrot.slane %v145_v2, %v947_v36  ;;  %v590_v41 = vld [vmem:[#allocation9 + $0x60] sm:$0xff] }
  0x55   :  { %460 = vmatprep.subr.mxu0 %v323_v3  ;;  %v116_v60 = vadd.f32 %v115_v51, %v114_v40  ;;  %v224_v62 = vadd.f32 %v223_v54, %v222_v42  ;;  %v166_v3 = vrot.slane %v124_v53, %v947_v36  ;;  %v245_v46 = vrot.slane %v244_v34, 1  ;;  %v366_v51 = vld [vmem:[#allocation8 + $0x180] sm:$0xff]  ;;  %v599_v54 = vld [vmem:[#allocation9 + $0xa8] sm:$0xff] }
  0x56   :  { %461 = vmatpush1.msra.mxu0 %v322_v9  ;;  %v138_v1 = vadd.f32 %v137_v44, %v136_v47  ;;  %v219_v8 = vrot.slane %v218_v57, 1  ;;  %v235_v9 = vrot.slane %v211_v7, 4  ;;  %v247_v22 = vsel %vm227_vm2, %v213_v61, 0.0 }
  0x57   :  { %462 = vmatprep.subr.mxu0 %v321_v15  ;;  %v152_v6 = vcombine.low %v109_v50, %v116_v60  ;;  %v225_v12 = vrot.slane %v224_v62, 1  ;;  %v374_v15 = vld [vmem:[#allocation8 + $0x1c0] sm:$0xff] }
  0x58   :  { %463 = vmatpush1.msra.mxu0 %v320_v21  ;;  %v168_v58 = vcombine.low %v131_v32, %v138_v1  ;;  %v236_v17 = vadd.f32 %v235_v9, %v211_v7  ;;  %v231_v21 = vrot.slane %v230_v14, 2  ;;  %v220_v25 = vadd.f32 %v219_v8, %v218_v57  ;;  %v360_v8 = vld [vmem:[#allocation8 + $0x150] sm:$0xff]  ;;  %v359_v9 = vld [vmem:[#allocation8 + $0x148] sm:$0xff] }
  0x59   :  { %464 = vmatprep.subr.mxu0 %v319_v28  ;;  %v159_v16 = vrot.slane %v152_v6, %v947_v36  ;;  %v248_v28 = vrot.slane %v247_v22, 4  ;;  %v226_v52 = vadd.f32 %v225_v12, %v224_v62  ;;  %v246_v32 = vadd.f32 %v245_v46, %v244_v34  ;;  %v592_v34 = vld [vmem:[#allocation9 + $0x70] sm:$0xff]  ;;  %v603_v46 = vld [vmem:[#allocation9 + $0xc8] sm:$0xff] }
  0x5a   :  { %465 = vmatpush1.msra.mxu0 %v318_v35  ;;  %v175_v20 = vrot.slane %v168_v58, %v947_v36  ;;  %v237_v26 = vrot.slane %v236_v17, 2  ;;  %v232_v13 = vadd.f32 %v231_v21, %v230_v14  ;;  %v358_v58 = vld [vmem:[#allocation8 + $0x140] sm:$0xff]  ;;  %v356_v14 = vld [vmem:[#allocation8 + $0x130] sm:$0xff] }
  0x5b   :  { %466 = vmatprep.subr.mxu0 %v381_v45  ;;  %v167_v7 = vcombine.low %v159_v16, %v166_v3  ;;  %v249_v35 = vadd.f32 %v248_v28, %v247_v22  ;;  %v260_v50 = vcombine.low %v220_v25, %v226_v52  ;;  %v352_v22 = vld [vmem:[#allocation8 + $0x110] sm:$0xff]  ;;  %v351_v25 = vld [vmem:[#allocation8 + $0x108] sm:$0xff] }
  0x5c   :  { %467 = vmatpush2.msra.mxu0 %v380_v38  ;;  %v183_v30 = vcombine.low %v175_v20, %v182_v11  ;;  %v238_v33 = vadd.f32 %v237_v26, %v236_v17  ;;  %v233_v42 = vrot.slane %v232_v13, 1  ;;  %v357_v11 = vld [vmem:[#allocation8 + $0x138] sm:$0xff]  ;;  %v354_v17 = vld [vmem:[#allocation8 + $0x120] sm:$0xff] }
  0x5d   :  { %468 = vmatprep.subr.mxu0 %v379_v55  ;;  %v250_v47 = vrot.slane %v249_v35, 2  ;;  %v267_v2 = vrot.slane %v260_v50, %v947_v36  ;;  %v353_v20 = vld [vmem:[#allocation8 + $0x118] sm:$0xff] }
  0x5e   :  { %469 = vmatpush2.msra.mxu0 %v378_v59  ;;  %v188_v40 = vrot.slane %v183_v30, 7  ;;  %v239_v45 = vrot.slane %v238_v33, 1  ;;  %v234_v38 = vadd.f32 %v233_v42, %v232_v13  ;;  %v364_v59 = vld [vmem:[#allocation8 + $0x170] sm:$0xff]  ;;  %v605_v42 = vld [vmem:[#allocation9 + $0xd8] sm:$0xff] }
  0x5f   :  { %470 = vmatprep.subr.mxu0 %v377_v0  ;;  %v251_v44 = vadd.f32 %v250_v47, %v249_v35  ;;  %v362_v0 = vld [vmem:[#allocation8 + $0x160] sm:$0xff]  ;;  %v607_v35 = vld [vmem:[#allocation9 + $0xe8] sm:$0xff]  ;;  %v585_v50 = vld [vmem:[#allocation9 + $0x38] sm:$0xff] }
  0x60   :  { %471 = vmatpush2.msra.mxu0 %v376_v5  ;;  %v190_v49 = vsel %vm189_vm5, %v188_v40, %v167_v7  ;;  %v240_v55 = vadd.f32 %v239_v45, %v238_v33  ;;  %v274_v3 = vrot.slane %v234_v38, %v947_v36  ;;  %v361_v5 = vld [vmem:[#allocation8 + $0x158] sm:$0xff]  ;;  %v608_v33 = vld [vmem:[#allocation9 + $0xf0] sm:$0xff]  ;;  %v587_v47 = vld [vmem:[#allocation9 + $0x48] sm:$0xff] }
  0x61   :  { %472 = vmatprep.subr.mxu0 %v375_v37  ;;  %v192_v53 = vsel %vm191_vm6, %v188_v40, %v190_v49  ;;  %v252_v61 = vrot.slane %v251_v44, 1  ;;  %v588_v45 = vld [vmem:[#allocation9 + $0x50] sm:$0xff]  ;;  %v586_v49 = vld [vmem:[#allocation9 + $0x40] sm:$0xff]  ;;  %v601_v38 = vld [vmem:[#allocation9 + $0xb8] sm:$0xff] }
  0x62   :  { %473 = vmatpush2.msra.mxu0 %v374_v15  ;;  %v194_v57 = vsel %vm193_vm9, %v188_v40, %v192_v53  ;;  %v276_v62 = vcombine.low %v240_v55, %v246_v32  ;;  %v275_v10 = vcombine.low %v267_v2, %v274_v3  ;;  %v355_v15 = vld [vmem:[#allocation8 + $0x128] sm:$0xff]  ;;  %v584_v53 = vld [vmem:[#allocation9 + $0x30] sm:$0xff]  ;;  %v598_v32 = vld [vmem:[#allocation9 + $0xa0] sm:$0xff]  ;;  %v402_v3 = vsub.s32 1, %v942_v24 }
  0x63   :  { %474 = vmatprep.subr.mxu0 %v373_v19  ;;  %v196_v60 = vsel %vm195_vm10, %v188_v40, %v194_v57  ;;  %v253_v1 = vadd.f32 %v252_v61, %v251_v44  ;;  %v606_v40 = vld [vmem:[#allocation9 + $0xe0] sm:$0xff]  ;;  %v583_v55 = vld [vmem:[#allocation9 + $0x28] sm:$0xff]  ;;  %v581_v57 = vld [vmem:[#allocation9 + $0x18] sm:$0xff] }
  0x64   :  { %475 = vmatpush2.msra.mxu0 %v372_v23  ;;  %203 = vst.msk [vmem:[#allocation2] sm:$0x3f] %vm1002_vm11, %v196_v60  ;;  %v283_v4 = vrot.slane %v276_v62, %v947_v36  ;;  %v582_v44 = vld [vmem:[#allocation9 + $0x20] sm:$0xff]  ;;  %v580_v60 = vld [vmem:[#allocation9 + $0x10] sm:$0xff]  ;;  %v595_v61 = vld [vmem:[#allocation9 + $0x88] sm:$0xff] }
  0x65   :  { %476 = vmatprep.subr.mxu0 %v371_v29  ;;  %v290_v6 = vrot.slane %v253_v1, %v947_v36  ;;  %v579_v62 = vld [vmem:[#allocation9 + $0x8] sm:$0xff]  ;;  %v398_v1 = vsub.s32 0, %v942_v24  ;;  %v394_v2 = vld [vmem:[%s1041_s3] sm:$0x3] }
  0x66   :  { %477 = vmatpush2.msra.mxu0 %v370_v31  ;;  %v593_v31 = vld [vmem:[#allocation9 + $0x78] sm:$0xff] }
  0x67   :  { %478 = vmatprep.subr.mxu0 %v369_v39  ;;  %v291_v37 = vcombine.low %v283_v4, %v290_v6  ;;  %v591_v39 = vld [vmem:[#allocation9 + $0x68] sm:$0xff]  ;;  %v399_v4 = vrot.slane %v394_v2, %v398_v1 }
  0x68   :  { %479 = vmatpush2.msra.mxu0 %v368_v43  ;;  %v589_v43 = vld [vmem:[#allocation9 + $0x58] sm:$0xff] }
  0x69   :  { %480 = vmatprep.subr.mxu0 %v367_v48  ;;  %v296_v12 = vrot.slane %v291_v37, 7  ;;  %v602_v48 = vld [vmem:[#allocation9 + $0xc0] sm:$0xff] }
  0x6a   :  { %481 = vmatpush2.msra.mxu0 %v366_v51  ;;  %v600_v51 = vld [vmem:[#allocation9 + $0xb0] sm:$0xff] }
  0x6b   :  { %482 = vmatprep.subr.mxu0 %v365_v56  ;;  %v298_v16 = vsel %vm189_vm5, %v296_v12, %v275_v10  ;;  %v214_v18 = vld [vmem:[#allocation2] sm:$0x3f] }
  0x6c   :  { %483 = vmatpush2.msra.mxu0 %v364_v59  ;;  %v300_v19 = vsel %vm191_vm6, %v296_v12, %v298_v16  ;;  %v597_v56 = vld [vmem:[#allocation9 + $0x98] sm:$0xff]  ;;  %v596_v59 = vld [vmem:[#allocation9 + $0x90] sm:$0xff] }
  0x6d   :  { %484 = vmatprep.subr.mxu0 %v363_v63  ;;  %v302_v21 = vsel %vm193_vm9, %v296_v12, %v300_v19  ;;  %v594_v63 = vld [vmem:[#allocation9 + $0x80] sm:$0xff] }
  0x6e   :  { %485 = vmatpush2.msra.mxu0 %v362_v0  ;;  %v304_v23 = vsel %vm195_vm10, %v296_v12, %v302_v21  ;;  %v578_v0 = vld [vmem:[#allocation9] sm:$0xff] }
  0x6f   :  { %486 = vmatprep.subr.mxu0 %v361_v5  ;;  %v306_v26 = vadd.f32 %v304_v23, %v214_v18  ;;  %v403_v5 = vrot.slane %v394_v2, %v402_v3 }
  0x70   :  { %487 = vmatpush2.msra.mxu0 %v360_v8 }
  0x71   :  { %488 = vmatprep.subr.mxu0 %v359_v9  ;;  %312 = vst.msk [vmem:[#allocation2] sm:$0x3f] %vm1002_vm11, %v306_v26 }
  0x72   :  { %489 = vmatpush2.msra.mxu0 %v358_v58 }
  0x73   :  { %490 = vmatprep.subr.mxu0 %v357_v11 }
  0x74   :  { %491 = vmatpush2.msra.mxu0 %v356_v14 }
  0x75   :  { %492 = vmatprep.subr.mxu0 %v355_v15 }
  0x76   :  { %493 = vmatpush2.msra.mxu0 %v354_v17  ;;  %v725_v17 = vld [vmem:[%s1043_s5] ss:$0 sm:$0xff] }
  0x77   :  { %494 = vmatprep.subr.mxu0 %v353_v20  ;;  %v726_v20 = vld [vmem:[%s1044_s6] ss:$0 sm:$0xff] }
  0x78   :  { %495 = vmatpush2.msra.mxu0 %v352_v22  ;;  %v316_v28 = vld [vmem:[#allocation2] sm:$0x3f] }
  0x79   :  { %496 = vmatprep.subr.mxu0 %v351_v25  ;;  %v317_v29 = vmul.f32 0.083333336, %v316_v28  ;;  %v727_v25 = vld [vmem:[#allocation3] ss:$0 sm:$0xff] }
  0x7a   :  { %497 = vmatpush2.msra.mxu0 %v350_v27 }
  0x7b   :  { %v407_v7 = vcombine.high %v317_v29, %v317_v29  ;;  %v414_v30 = vrot.slane %v317_v29, %v947_v36 }
  0x7d   :  { %v422_v52 = vcombine.high %v414_v30, %v414_v30  ;;  %v421_v13 = vrot.slane %v407_v7, %v947_v36  ;;  %v604_v36 = vld [vmem:[#allocation9 + $0xd0] sm:$0xff] }
  0x7f   :  { %498 = vmatprep.mubr.f32.mxu0 %v422_v52  ;;  %724 = vmatmul.mubr.msk.f32.vlgmr.msra.gmra.mxu1 %vm227_vm2, %v421_v13 }
  0x80   :  { %499 = vmatmul.mubr.f32.vlgmr.msra.gmra.mxu0 %v414_v30  ;;  %730 = vmatpush3.msra.mxu1 %v593_v31 }
  0x81   :  { %731 = vmatprep.subr.mxu1 %v608_v33 }
  0x82   :  { %732 = vmatpush3.msra.mxu1 %v592_v34 }
  0x83   :  { %733 = vmatprep.subr.mxu1 %v607_v35 }
  0x84   :  { %734 = vmatpush3.msra.mxu1 %v591_v39 }
  0x85   :  { %735 = vmatprep.subr.mxu1 %v606_v40 }
  0x86   :  { %736 = vmatpush3.msra.mxu1 %v590_v41 }
  0x87   :  { %737 = vmatprep.subr.mxu1 %v605_v42 }
  0x88   :  { %738 = vmatpush3.msra.mxu1 %v589_v43 }
  0x89   :  { %739 = vmatprep.subr.mxu1 %v604_v36 }
  0x8a   :  { %740 = vmatpush3.msra.mxu1 %v588_v45 }
  0x8b   :  { %741 = vmatprep.subr.mxu1 %v603_v46 }
  0x8c   :  { %742 = vmatpush3.msra.mxu1 %v587_v47 }
  0x8d   :  { %743 = vmatprep.subr.mxu1 %v602_v48 }
  0x8e   :  { %744 = vmatpush3.msra.mxu1 %v586_v49 }
  0x8f   :  { %745 = vmatprep.subr.mxu1 %v601_v38 }
  0x90   :  { %746 = vmatpush3.msra.mxu1 %v585_v50 }
  0x91   :  { %747 = vmatprep.subr.mxu1 %v600_v51 }
  0x92   :  { %748 = vmatpush3.msra.mxu1 %v584_v53 }
  0x93   :  { %749 = vmatprep.subr.mxu1 %v599_v54 }
  0x94   :  { %750 = vmatpush3.msra.mxu1 %v583_v55 }
  0x95   :  { %751 = vmatprep.subr.mxu1 %v598_v32 }
  0x96   :  { %752 = vmatpush3.msra.mxu1 %v582_v44 }
  0x97   :  { %753 = vmatprep.subr.mxu1 %v597_v56 }
  0x98   :  { %754 = vmatpush3.msra.mxu1 %v581_v57 }
  0x99   :  { %755 = vmatprep.subr.mxu1 %v596_v59 }
  0x9a   :  { %756 = vmatpush3.msra.mxu1 %v580_v60 }
  0x9b   :  { %757 = vmatprep.subr.mxu1 %v595_v61 }
  0x9c   :  { %758 = vmatpush3.msra.mxu1 %v579_v62 }
  0x9d   :  { %759 = vmatprep.subr.mxu1 %v594_v63 }
  0x9e   :  { %760 = vmatpush3.msra.mxu1 %v578_v0 }
 0x13f   :  { %v571_v8 = vpop.f32.mrf.mxu1 }
 0x140   :  { %v500_v6 = vpop.f32.mrf.mxu0 }
 0x141   :  { %v501_v9 = vadd.f32 %v500_v6, %v399_v4  ;;  %v573_v11 = vpop.f32.mrf.mxu1 }
 0x142   :  { %v502_v10 = vpop.f32.mrf.mxu0 }
 0x143   :  { %v503_v37 = vadd.f32 %v502_v10, %v403_v5  ;;  %v572_v58 = vadd.f32 %v571_v8, %v501_v9 }
 0x145   :  { %v574_v12 = vadd.f32 %v573_v11, %v503_v37  ;;  %v576_v15 = vmax.f32 %v572_v58, 0.0 }
 0x147   :  { %v577_v14 = vmax.f32 %v574_v12, 0.0 }
 0x149   :  { %681 = vmatprep.mubr.f32.mxu1 %v577_v14 }
 0x14a   :  { %682 = vmatmul.mubr.f32.vlgmr.msra.gmra.mxu1 %v576_v15 }
 0x20a   :  { %v761_v16 = vpop.f32.mrf.mxu1 }
 0x20c   :  { %v762_v24 = vpop.f32.mrf.mxu1 }
 0x20d   :  { %v763_v18 = vadd.f32 %v762_v24, %v761_v16 }
 0x20f   :  { %v684_v19 = vadd.f32 %v763_v18, %v725_v17 }
 0x211   :  { %v687_v21 = vmax.f32 %v684_v19, 0.0 }
 0x213   :  { %v695_v22 = vmul.f32 %v726_v20, %v687_v21 }
 0x215   :  { %v696_v23 = vsel %vm198_vm3, %v695_v22, 0.0 }
 0x216   :  { %697 = vadd.xlane.f32.xlu0 %v696_v23 }
 0x29f   :  { %v698_v26 = vpop.xlane.xlu0 %697 }
 0x2a0   :  { %v706_v27 = vadd.f32 %v727_v25, %v698_v26 }
 0x2a2   :  { %v728_v28 = vmul.f32 -1.442695, %v706_v27 }
 0x2a4   :  { %778 = vpow2.f32 %v728_v28 }
 0x2b1   :  { %v779_v29 = vpop.eup %778 }
 0x2b2   :  { %v710_v7 = vadd.f32 1.0, %v779_v29 }
 0x2b4   :  { %780 = vrcp.f32 %v710_v7 }
 0x2c1   :  { %v781_v30 = vpop.eup %780 }
 0x2c2   :  { %714 = vst.msk [vmem:[%s1046_s8] sm:$0x3] %vm713_vm12, %v781_v30 }
 0x2c3   :  { %719 = vsyncpa [#allocation5], 1 }
 0x2c4   :  { %720 = vsyncpa [#allocation7], 1 }
 0x2c5   :  { %721 = vsyncpa [#allocation10], 1 }

</bundles_post_ra>
